<compile_context>
chip_gen: v6e
topology: v6e:2x2x1
jax: 0.10.0
libtpu: 0.0.40
codegen_flags: <defaults>
</compile_context>

<pallas_src>
import functools

import jax
import jax.numpy as jnp
from jax.experimental import pallas as pl
from jax.experimental.pallas import tpu as pltpu


def _make_nll_kernel(n_total: int, tile_n: int):
    """Build the kernel with static N and tile size baked in."""
    inv_n = 1.0 / float(n_total)
    needs_mask = (n_total % tile_n) != 0

    def kernel(pred_ref, target_ref, out_ref, acc_ref):
        i = pl.program_id(0)

        @pl.when(i == 0)
        def _init():
            acc_ref[0, 0] = jnp.float32(0.0)

        pred = pred_ref[...].astype(jnp.float32)   # (TN, C) upcast in-kernel
        tgt = target_ref[...]                      # (TN, 1) int32

        tn, c = pred.shape
        col = jax.lax.broadcasted_iota(jnp.int32, (tn, c), 1)

        # One-hot selection of the target class.  For a partial last tile,
        # also mask rows past N.  jnp.where (select) avoids NaN propagation
        # from undefined padded data.
        sel = col == tgt
        if needs_mask:
            row = jax.lax.broadcasted_iota(jnp.int32, (tn, c), 0)
            sel = jnp.logical_and(sel, (row + i * tile_n) < n_total)
        picked = jnp.where(sel, pred, jnp.float32(0.0))

        acc_ref[0, 0] += jnp.sum(picked)

        @pl.when(i == pl.num_programs(0) - 1)
        def _finalize():
            out_ref[0, 0] = -acc_ref[0, 0] * jnp.float32(inv_n)

    return kernel


def _choose_tile_n(n: int, c: int, itemsize: int) -> int:
    """Row-tile size targeting a few MiB of VMEM per pipeline buffer."""
    lane_c = ((max(c, 1) + 127) // 128) * 128          # lane-padded pred width
    per_row = lane_c * itemsize + 128 * 4              # pred tile + padded target tile
    budget = 8 * 1024 * 1024                           # per buffer; x2 double-buffered
    tn = max(8, (budget // per_row) // 8 * 8)
    return n if n <= tn else tn


@functools.partial(jax.jit, static_argnames=("tile_n",))
def nll_loss(pred, target, weight=None, *, tile_n: int = None):
    """Pallas TPU implementation of F.nll_loss(pred, target), mean reduction.

    pred:   (N, C) log-probabilities (any float dtype; accumulation is f32).
    target: (N,) integer class indices.
    """
    # TODO(synk): per-class `weight` is not supported (PointNet always calls
    #             with weight=None); raise if provided.
    if weight is not None:
        raise NotImplementedError("weight is not supported")

    n, c = pred.shape

    if tile_n is None:
        tn = _choose_tile_n(n, c, jnp.dtype(pred.dtype).itemsize)
    else:
        # Explicit override (multiple of 8 per the sublane constraint, unless
        # the whole array fits in a single tile).
        tn = n if n <= tile_n else max(8, (tile_n // 8) * 8)

    grid = (pl.cdiv(n, tn),)
    target2d = target.astype(jnp.int32).reshape(n, 1)

    out = pl.pallas_call(
        _make_nll_kernel(n, tn),
        out_shape=jax.ShapeDtypeStruct((1, 1), jnp.float32),
        grid_spec=pltpu.PrefetchScalarGridSpec(
            num_scalar_prefetch=0,
            grid=grid,
            in_specs=[
                pl.BlockSpec((tn, c), lambda i: (i, 0)),
                pl.BlockSpec((tn, 1), lambda i: (i, 0)),
            ],
            out_specs=pl.BlockSpec(memory_space=pltpu.MemorySpace.SMEM),
            scratch_shapes=[pltpu.SMEM((1, 1), jnp.float32)],
        ),
        compiler_params=pltpu.CompilerParams(
            dimension_semantics=("arbitrary",),
        ),
    )(pred, target2d)
    return out[0, 0]


if __name__ == "__main__":
    key = jax.random.PRNGKey(0)
    k1, k2, k3, k4 = jax.random.split(key, 4)

    # Case 1: small classification-style input (single tile path), f32.
    N, C = 8, 32
    logits = jax.random.normal(k1, (N, C), dtype=jnp.float32)
    pred = jax.nn.log_softmax(logits, axis=-1)
    target = jax.random.randint(k2, (N,), 0, C, dtype=jnp.int32)

    loss = nll_loss(pred, target)
    jax.block_until_ready(loss)
    ref = -jnp.mean(pred[jnp.arange(N), target])
    assert jnp.allclose(loss, ref, atol=1e-5, rtol=1e-5), (loss, ref)

    # Case 2: multi-tile path with a partial last tile and bf16 log-probs
    # (native-dtype load + f32 in-kernel accumulation).
    N2, C2 = 40, 13
    logits2 = jax.random.normal(k3, (N2, C2), dtype=jnp.float32)
    pred2 = jax.nn.log_softmax(logits2, axis=-1).astype(jnp.bfloat16)
    target2 = jax.random.randint(k4, (N2,), 0, C2, dtype=jnp.int32)

    loss2 = nll_loss(pred2, target2, tile_n=16)   # 3 grid steps, last partial
    jax.block_until_ready(loss2)
    ref2 = -jnp.mean(pred2.astype(jnp.float32)[jnp.arange(N2), target2])
    assert jnp.allclose(loss2, ref2, atol=1e-3, rtol=1e-3), (loss2, ref2)

    print("KERNEL_OK")
</pallas_src>

<mosaic_0001>
module attributes {stable_mosaic.version = 11 : i64} {
  func.func @kernel(%arg0: i32, %arg1: memref<8x32xf32, #tpu.memory_space<vmem>>, %arg2: memref<8x1xi32, #tpu.memory_space<vmem>>, %arg3: memref<1x1xf32, #tpu.memory_space<smem>>, %arg4: memref<1x1xf32, #tpu.memory_space<smem>>) attributes {dimension_semantics = [#tpu.dimension_semantics<arbitrary>], iteration_bounds = array<i64: 1>, scalar_prefetch = 0 : i64, scratch_operands = 1 : i64, tpu.core_type = #tpu.core_type<tc>, window_params = [{transform_indices = @transform_0, window_bounds = array<i64: 8, 32>}, {transform_indices = @transform_1, window_bounds = array<i64: 8, 1>}, {transform_indices = @transform_2, window_bounds = array<i64: 1, 1>}]} {
    %c0_i32 = arith.constant 0 : i32
    %0 = arith.cmpi eq, %arg0, %c0_i32 : i32
    %1 = arith.extui %0 : i1 to i32
    %c0_i32_0 = arith.constant 0 : i32
    %2 = arith.cmpi ne, %1, %c0_i32_0 : i32
    scf.if %2 {
      %cst_11 = arith.constant 0.000000e+00 : f32
      %c0_12 = arith.constant 0 : index
      %c0_13 = arith.constant 0 : index
      %20 = memref.load %arg4[%c0_12, %c0_13] : memref<1x1xf32, #tpu.memory_space<smem>>
      memref.store %cst_11, %arg4[%c0_12, %c0_13] : memref<1x1xf32, #tpu.memory_space<smem>>
    } else {
    }
    %c0 = arith.constant 0 : index
    %c0_1 = arith.constant 0 : index
    %3 = vector.load %arg1[%c0, %c0_1] : memref<8x32xf32, #tpu.memory_space<vmem>>, vector<8x32xf32>
    %c0_2 = arith.constant 0 : index
    %c0_3 = arith.constant 0 : index
    %4 = vector.load %arg2[%c0_2, %c0_3] : memref<8x1xi32, #tpu.memory_space<vmem>>, vector<8x1xi32>
    %5 = tpu.iota {dimensions = array<i32: 1>} : vector<8x32xi32>
    %6 = vector.broadcast %4 : vector<8x1xi32> to vector<8x32xi32>
    %7 = arith.cmpi eq, %5, %6 : vector<8x32xi32>
    %cst = arith.constant 0.000000e+00 : f32
    %8 = vector.broadcast %cst : f32 to vector<8x32xf32>
    %9 = arith.select %7, %3, %8 : vector<8x32xi1>, vector<8x32xf32>
    %c0_4 = arith.constant 0 : index
    %c0_5 = arith.constant 0 : index
    %10 = memref.load %arg4[%c0_4, %c0_5] : memref<1x1xf32, #tpu.memory_space<smem>>
    %11 = vector.shape_cast %9 : vector<8x32xf32> to vector<1x8x32xf32>
    %cst_6 = arith.constant dense<0.000000e+00> : vector<1xf32>
    %12 = vector.multi_reduction <add>, %11, %cst_6 [1, 2] : vector<1x8x32xf32> to vector<1xf32>
    %13 = vector.shape_cast %12 : vector<1xf32> to vector<1x1x1xf32>
    %14 = vector.extract %13[0, 0, 0] : f32 from vector<1x1x1xf32>
    %15 = arith.addf %10, %14 : f32
    %c0_7 = arith.constant 0 : index
    %c0_8 = arith.constant 0 : index
    %16 = memref.load %arg4[%c0_7, %c0_8] : memref<1x1xf32, #tpu.memory_space<smem>>
    memref.store %15, %arg4[%c0_7, %c0_8] : memref<1x1xf32, #tpu.memory_space<smem>>
    %c0_i32_9 = arith.constant 0 : i32
    %17 = arith.cmpi eq, %arg0, %c0_i32_9 : i32
    %18 = arith.extui %17 : i1 to i32
    %c0_i32_10 = arith.constant 0 : i32
    %19 = arith.cmpi ne, %18, %c0_i32_10 : i32
    scf.if %19 {
      %c0_11 = arith.constant 0 : index
      %c0_12 = arith.constant 0 : index
      %20 = memref.load %arg4[%c0_11, %c0_12] : memref<1x1xf32, #tpu.memory_space<smem>>
      %cst_13 = arith.constant 0.000000e+00 : f32
      %21 = arith.subf %cst_13, %20 : f32
      %cst_14 = arith.constant 1.250000e-01 : f32
      %22 = arith.mulf %21, %cst_14 : f32
      %c0_15 = arith.constant 0 : index
      %c0_16 = arith.constant 0 : index
      %23 = memref.load %arg3[%c0_15, %c0_16] : memref<1x1xf32, #tpu.memory_space<smem>>
      memref.store %22, %arg3[%c0_15, %c0_16] : memref<1x1xf32, #tpu.memory_space<smem>>
    } else {
    }
    return
  }
  func.func @transform_0(%arg0: i32) -> (i32, i32) {
    %c0_i32 = arith.constant 0 : i32
    %c0_i32_0 = arith.constant 0 : i32
    return %arg0, %c0_i32 : i32, i32
  }
  func.func @transform_1(%arg0: i32) -> (i32, i32) {
    %c0_i32 = arith.constant 0 : i32
    %c0_i32_0 = arith.constant 0 : i32
    return %arg0, %c0_i32 : i32, i32
  }
  func.func @transform_2(%arg0: i32) -> (i32, i32) {
    %c0_i32 = arith.constant 0 : i32
    %c0_i32_0 = arith.constant 0 : i32
    %c0_i32_1 = arith.constant 0 : i32
    return %c0_i32, %c0_i32_0 : i32, i32
  }
}

</mosaic_0001>

<bundles_post_ra>
// kernel: nll_loss.1
= control target key start
LH: loop header
LB: loop body
LE: loop exit
PB: predicated region body
PF: predicated region fallthrough
CT: control target
= control target key end

     0   :  { %s104_s0 = inlined_call_operand.vmem [shape: f32[8,32], index: 0, kind: input, shape index: {}]   ;;  %s105_s1 = inlined_call_operand.vmem [shape: s32[8,1], index: 1, kind: input, shape index: {}]   ;;  %s106_s2 = inlined_call_operand.hbm [shape: f32[1,1], index: 2, kind: output, shape index: {}]  }
   0x1   :  { %v19_v0 = vld [vmem:[%s105_s1] sm:$0xff] }
   0x2   :  { %7 = vsyncpa [#allocation4], 0  ;;  %v78_v1 = vmov 0   ;;  %v20_v2 = vlaneseq  ;;  %v18_v4 = vld [vmem:[%s104_s0] sm:$0xff]  ;;  %vm28_vm0 = vcmask 261120   ;;  %s79_s15 = smov [#allocation3]  }
   0x3   :  { %67 = vset.pattern.permute.xlu0 %v78_v1 }
   0x4   :  { %23 = vperm.xlu0 %67, %v19_v0   ;;  %v21_v3 = vand.u32 127, %v20_v2 }
  0x7f   :  { %v24_v5 = vpop.permute.xlu0 %23 }
  0x80   :  { %vm25_vm1 = vcmp.eq.s32.totalorder %v21_v3, %v24_v5 }
  0x81   :  { %v26_v6 = vsel %vm25_vm1, %v18_v4, 0.0 }
  0x82   :  { %v29_v7 = vsel %vm28_vm0, %v26_v6, 0.0 }
  0x83   :  { %30 = vadd.xlane.f32.xlu0 %v29_v7 }
 0x10c   :  { %v31_v8 = vpop.xlane.xlu0 %30 }
 0x10d   :  { %v32_v9 = vrot.slane %v31_v8, 4 }
 0x10f   :  { %v33_v10 = vadd.f32 %v32_v9, %v31_v8 }
 0x111   :  { %v34_v11 = vrot.slane %v33_v10, 2 }
 0x113   :  { %v35_v12 = vadd.f32 %v34_v11, %v33_v10 }
 0x115   :  { %v36_v13 = vrot.slane %v35_v12, 1 }
 0x117   :  { %v37_v14 = vadd.f32 %v36_v13, %v35_v12 }
 0x119   :  { %63 = vpush %v37_v14 }
 0x14a   :  { %s64_s1 = spop %63 }
 0x14b   :  { %s46_s13 = ssub.f32 0.0, %s64_s1 }
 0x14d   :  { %s47_s14 = smul.f32 0.125, %s46_s13 }
 0x14f   :  { %49 = sst [smem:[#allocation3]] %s47_s14 }
 0x150   :  { %57 = dma.smem_to_hbm %s79_s15, 16, %s106_s2, [#allocation4]  }
 0x151   :  { %76 = dma.done.wait [#allocation4], 16  }
 0x152   :  { %77 = vsyncadd [#allocation4], 4294967280 }
 0x153   :  { %61 = sfence }
 0x154   :  { %62 = vsyncpa [#allocation4], 1 }

</bundles_post_ra>
